<compile_context>
chip_gen: v5e
topology: v5e:2x2
jax: 0.10.0
libtpu: 0.0.40
codegen_flags: <defaults>
</compile_context>

<pallas_src>
import jax
import jax.numpy as jnp
from jax.experimental import pallas as pl
from jax.experimental.pallas import tpu as pltpu


def _round_up(x, m):
    return ((x + m - 1) // m) * m


def _round_down(x, m):
    return (x // m) * m


def _vmem_budget_bytes():
    """Physical VMEM of the local TPU generation, minus headroom for Mosaic scratch."""
    try:
        cap = int(pltpu.get_tpu_info().vmem_capacity_bytes)
    except Exception:
        cap = 48 << 20  # conservative fallback that fits every generation (v7x = 64 MiB)
    return (cap * 7) // 8


def ffn_kernel(x_ref, w1_ref, b1_ref, w2_ref, b2_ref, o_ref):
    # linear1 on the MXU (bf16 operands, f32 accumulation).
    h = jnp.dot(x_ref[...], w1_ref[...], preferred_element_type=jnp.float32)
    # bias + ReLU in f32 on the VPU (hidden under MXU slack; v5e has no bf16 VALU).
    h = jnp.maximum(h + b1_ref[...], 0.0)
    # linear2 on the MXU; re-cast the activation to the weight compute dtype.
    y = jnp.dot(h.astype(w2_ref.dtype), w2_ref[...],
                preferred_element_type=jnp.float32)
    o_ref[...] = (y + b2_ref[...]).astype(o_ref.dtype)


def prepare_ffn_params(w1, b1, w2, b2, *, compute_dtype=jnp.bfloat16):
    """One-time weight prep: transpose to (in, out), pad lanes to 128, cast.

    w1: (H, K), b1: (H,), w2: (N, H), b2: (N,)  -- PyTorch nn.Linear layout.
    Returns (w1t, b1p, w2t, b2p, (K, H, N)) ready for ffn_apply.
    Zero padding is exact: padded K columns contribute 0, padded hidden units
    are relu(0)=0 hitting zero W2 rows, padded N columns are sliced off.
    """
    H, K = w1.shape
    N, H2 = w2.shape
    assert H2 == H
    Kp, Hp, Np = _round_up(K, 128), _round_up(H, 128), _round_up(N, 128)
    w1t = jnp.pad(w1.T.astype(compute_dtype), ((0, Kp - K), (0, Hp - H)))  # (Kp, Hp)
    w2t = jnp.pad(w2.T.astype(compute_dtype), ((0, Hp - H), (0, Np - N)))  # (Hp, Np)
    # Biases stay f32: bias-add runs in f32 and they are tiny.
    b1p = jnp.pad(b1.astype(jnp.float32), (0, Hp - H)).reshape(1, Hp)
    b2p = jnp.pad(b2.astype(jnp.float32), (0, Np - N)).reshape(1, Np)
    return w1t, b1p, w2t, b2p, (K, H, N)


def _build_call(Mp, Kp, Hp, Np, tm, out_dtype, vmem_limit, single_buffer_weights):
    if single_buffer_weights:
        def resident(shape):
            # Constant index_map -> DMA'd once; 1 buffer halves weight VMEM.
            return pl.BlockSpec(shape, lambda i: (0, 0),
                                pipeline_mode=pl.Buffered(1))
    else:
        def resident(shape):
            return pl.BlockSpec(shape, lambda i: (0, 0))

    return pl.pallas_call(
        ffn_kernel,
        out_shape=jax.ShapeDtypeStruct((Mp, Np), out_dtype),
        grid=(pl.cdiv(Mp, tm),),
        in_specs=[
            pl.BlockSpec((tm, Kp), lambda i: (i, 0)),   # streamed activation tiles
            resident((Kp, Hp)),                         # VMEM-resident W1
            resident((1, Hp)),                          # VMEM-resident b1
            resident((Hp, Np)),                         # VMEM-resident W2
            resident((1, Np)),                          # VMEM-resident b2
        ],
        out_specs=pl.BlockSpec((tm, Np), lambda i: (i, 0)),  # lane-dense stores
        compiler_params=pltpu.CompilerParams(
            dimension_semantics=("parallel",),
            vmem_limit_bytes=vmem_limit,
        ),
    )


def ffn_apply(x, params, *, tile_m=512):
    """relu(x @ W1^T + b1) @ W2^T + b2 for x of shape (..., K)."""
    w1t, b1p, w2t, b2p, (K, H, N) = params
    Kp, Hp = w1t.shape
    Np = w2t.shape[1]
    out_dtype = x.dtype

    lead = x.shape[:-1]
    assert x.shape[-1] == K
    M = 1
    for d in lead:
        M *= d
    x2 = x.reshape(M, K)

    # Pad rows to the bf16 sublane pack (16), lanes to 128, cast to compute dtype.
    Mp = _round_up(max(M, 1), 16)
    xp = jnp.pad(x2, ((0, Mp - M), (0, Kp - K))).astype(w1t.dtype)

    # ---- VMEM-aware row-tile size ----------------------------------------
    budget = _vmem_budget_bytes()
    w_item = jnp.dtype(w1t.dtype).itemsize
    x_item = jnp.dtype(xp.dtype).itemsize
    o_item = jnp.dtype(out_dtype).itemsize
    # Worst case: Pallas double-buffers even the constant-index weight blocks.
    weight_bytes = 2 * ((Kp * Hp + Hp * Np) * w_item + (Hp + Np) * 4)
    # Per-row cost: double-buffered x / out slabs + f32 intermediates.
    row_bytes = 2 * (Kp * x_item + Np * o_item) + (Hp + Np) * 4

    tm = min(_round_up(tile_m, 16), Mp)
    if budget > weight_bytes:
        tm_fit = _round_down((budget - weight_bytes) // row_bytes, 16)
        if 16 <= tm_fit < tm:
            tm = tm_fit
    # TODO(synk): if weight_bytes alone exceeds the budget, tile H (reduction
    # axis + f32 accumulator) or N instead of keeping both weights resident.

    # Small-batch / single-tile case: split M so both v7x TensorCores get a
    # tile (harmless ~0.35us extra grid step on single-core v5e/v6e).
    if pl.cdiv(Mp, tm) == 1 and Mp >= 512:
        tm = _round_up(pl.cdiv(Mp, 2), 16)

    footprint = weight_bytes + tm * row_bytes
    vmem_limit = int(min(budget, max(footprint + footprint // 4, 32 << 20)))

    args = (xp, w1t, b1p, w2t, b2p)
    try:
        out_p = _build_call(Mp, Kp, Hp, Np, tm, out_dtype, vmem_limit,
                            single_buffer_weights=True)(*args)
    except Exception:
        # Installed Pallas rejected pipeline_mode=Buffered(1): default buffering.
        out_p = _build_call(Mp, Kp, Hp, Np, tm, out_dtype, vmem_limit,
                            single_buffer_weights=False)(*args)

    return out_p[:M, :N].reshape(lead + (N,))


def ffn_forward(x, w1, b1, w2, b2, *, compute_dtype=jnp.bfloat16, tile_m=512):
    """Convenience wrapper; prefer prepare_ffn_params + ffn_apply for reuse."""
    params = prepare_ffn_params(w1, b1, w2, b2, compute_dtype=compute_dtype)
    return ffn_apply(x, params, tile_m=tile_m)


def init_linear_params(key, in_features, out_features, dtype=jnp.float32):
    """PyTorch nn.Linear default init: U(-1/sqrt(in), 1/sqrt(in))."""
    kw, kb = jax.random.split(key)
    bound = 1.0 / (in_features ** 0.5)
    w = jax.random.uniform(kw, (out_features, in_features), dtype,
                           minval=-bound, maxval=bound)
    b = jax.random.uniform(kb, (out_features,), dtype,
                           minval=-bound, maxval=bound)
    return w, b


def _reference(x, w1, b1, w2, b2):
    return jnp.maximum(x @ w1.T + b1, 0.0) @ w2.T + b2


if __name__ == "__main__":
    key = jax.random.PRNGKey(0)

    # --- Test 1: module-sized example (batch=8, 32 -> 64 -> 32) ---
    batch, input_dim, hidden_dim, output_dim = 8, 32, 64, 32
    kx, k1, k2, key = jax.random.split(key, 4)
    x = jax.random.normal(kx, (batch, input_dim), jnp.float32)
    w1, b1 = init_linear_params(k1, input_dim, hidden_dim)
    w2, b2 = init_linear_params(k2, hidden_dim, output_dim)

    params = prepare_ffn_params(w1, b1, w2, b2)
    out = jax.block_until_ready(ffn_apply(x, params))
    ref = _reference(x, w1, b1, w2, b2)
    assert out.shape == (batch, output_dim)
    assert jnp.allclose(out, ref, atol=2e-2, rtol=2e-2), (
        "max abs err", float(jnp.max(jnp.abs(out - ref))))

    # --- Test 2: multi-tile grid + padding (unaligned dims, partial last tile) ---
    batch2, in2, hid2, out2 = 200, 96, 192, 80
    kx, k1, k2, key = jax.random.split(key, 4)
    x2 = jax.random.normal(kx, (batch2, in2), jnp.float32)
    w1b, b1b = init_linear_params(k1, in2, hid2)
    w2b, b2b = init_linear_params(k2, hid2, out2)

    out_t = jax.block_until_ready(
        ffn_forward(x2, w1b, b1b, w2b, b2b, tile_m=64))
    ref_t = _reference(x2, w1b, b1b, w2b, b2b)
    assert out_t.shape == (batch2, out2)
    assert jnp.allclose(out_t, ref_t, atol=3e-2, rtol=3e-2), (
        "max abs err", float(jnp.max(jnp.abs(out_t - ref_t))))

    print("KERNEL_OK")
</pallas_src>

<mosaic_0001>
module attributes {stable_mosaic.version = 11 : i64} {
  func.func @ffn_kernel(%arg0: i32, %arg1: memref<16x128xbf16, #tpu.memory_space<vmem>>, %arg2: memref<128x128xbf16, #tpu.memory_space<vmem>>, %arg3: memref<1x128xf32, #tpu.memory_space<vmem>>, %arg4: memref<128x128xbf16, #tpu.memory_space<vmem>>, %arg5: memref<1x128xf32, #tpu.memory_space<vmem>>, %arg6: memref<16x128xf32, #tpu.memory_space<vmem>>) attributes {dimension_semantics = [#tpu.dimension_semantics<parallel>], iteration_bounds = array<i64: 1>, scalar_prefetch = 0 : i64, scratch_operands = 0 : i64, tpu.core_type = #tpu.core_type<tc>, window_params = [{transform_indices = @transform_0, window_bounds = array<i64: 16, 128>}, {pipeline_mode = #tpu.pipeline_mode<synchronous>, transform_indices = @transform_1, window_bounds = array<i64: 128, 128>}, {pipeline_mode = #tpu.pipeline_mode<synchronous>, transform_indices = @transform_2, window_bounds = array<i64: 1, 128>}, {pipeline_mode = #tpu.pipeline_mode<synchronous>, transform_indices = @transform_3, window_bounds = array<i64: 128, 128>}, {pipeline_mode = #tpu.pipeline_mode<synchronous>, transform_indices = @transform_4, window_bounds = array<i64: 1, 128>}, {transform_indices = @transform_5, window_bounds = array<i64: 16, 128>}]} {
    %c0 = arith.constant 0 : index
    %c0_0 = arith.constant 0 : index
    %0 = vector.load %arg1[%c0, %c0_0] : memref<16x128xbf16, #tpu.memory_space<vmem>>, vector<16x128xbf16>
    %c0_1 = arith.constant 0 : index
    %c0_2 = arith.constant 0 : index
    %1 = vector.load %arg2[%c0_1, %c0_2] : memref<128x128xbf16, #tpu.memory_space<vmem>>, vector<128x128xbf16>
    %cst = arith.constant dense<0.000000e+00> : vector<16x128xf32>
    %2 = tpu.matmul %0, %1, %cst {dimension_numbers = #tpu.dot_dimension_numbers<[1], [0], [0], [1], [0, 0, 1, 1], [], []>} : vector<16x128xbf16>, vector<128x128xbf16>, vector<16x128xf32> -> vector<16x128xf32>
    %c0_3 = arith.constant 0 : index
    %c0_4 = arith.constant 0 : index
    %3 = vector.load %arg3[%c0_3, %c0_4] : memref<1x128xf32, #tpu.memory_space<vmem>>, vector<1x128xf32>
    %4 = vector.broadcast %3 : vector<1x128xf32> to vector<16x128xf32>
    %5 = arith.addf %2, %4 : vector<16x128xf32>
    %cst_5 = arith.constant 0.000000e+00 : f32
    %6 = vector.broadcast %cst_5 : f32 to vector<16x128xf32>
    %7 = arith.maximumf %5, %6 : vector<16x128xf32>
    %8 = arith.truncf %7 : vector<16x128xf32> to vector<16x128xbf16>
    %c0_6 = arith.constant 0 : index
    %c0_7 = arith.constant 0 : index
    %9 = vector.load %arg4[%c0_6, %c0_7] : memref<128x128xbf16, #tpu.memory_space<vmem>>, vector<128x128xbf16>
    %cst_8 = arith.constant dense<0.000000e+00> : vector<16x128xf32>
    %10 = tpu.matmul %8, %9, %cst_8 {dimension_numbers = #tpu.dot_dimension_numbers<[1], [0], [0], [1], [0, 0, 1, 1], [], []>} : vector<16x128xbf16>, vector<128x128xbf16>, vector<16x128xf32> -> vector<16x128xf32>
    %c0_9 = arith.constant 0 : index
    %c0_10 = arith.constant 0 : index
    %11 = vector.load %arg5[%c0_9, %c0_10] : memref<1x128xf32, #tpu.memory_space<vmem>>, vector<1x128xf32>
    %12 = vector.broadcast %11 : vector<1x128xf32> to vector<16x128xf32>
    %13 = arith.addf %10, %12 : vector<16x128xf32>
    %c0_11 = arith.constant 0 : index
    %c0_12 = arith.constant 0 : index
    %14 = vector.load %arg6[%c0_11, %c0_12] : memref<16x128xf32, #tpu.memory_space<vmem>>, vector<16x128xf32>
    tpu.vector_store %arg6[%c0_11, %c0_12], %13 {strides = array<i32>} : memref<16x128xf32, #tpu.memory_space<vmem>>, vector<16x128xf32>,
    return
  }
  func.func @transform_0(%arg0: i32) -> (i32, i32) {
    %c0_i32 = arith.constant 0 : i32
    %c0_i32_0 = arith.constant 0 : i32
    return %arg0, %c0_i32 : i32, i32
  }
  func.func @transform_1(%arg0: i32) -> (i32, i32) {
    %c0_i32 = arith.constant 0 : i32
    %c0_i32_0 = arith.constant 0 : i32
    %c0_i32_1 = arith.constant 0 : i32
    return %c0_i32, %c0_i32_0 : i32, i32
  }
  func.func @transform_2(%arg0: i32) -> (i32, i32) {
    %c0_i32 = arith.constant 0 : i32
    %c0_i32_0 = arith.constant 0 : i32
    %c0_i32_1 = arith.constant 0 : i32
    return %c0_i32, %c0_i32_0 : i32, i32
  }
  func.func @transform_3(%arg0: i32) -> (i32, i32) {
    %c0_i32 = arith.constant 0 : i32
    %c0_i32_0 = arith.constant 0 : i32
    %c0_i32_1 = arith.constant 0 : i32
    return %c0_i32, %c0_i32_0 : i32, i32
  }
  func.func @transform_4(%arg0: i32) -> (i32, i32) {
    %c0_i32 = arith.constant 0 : i32
    %c0_i32_0 = arith.constant 0 : i32
    %c0_i32_1 = arith.constant 0 : i32
    return %c0_i32, %c0_i32_0 : i32, i32
  }
  func.func @transform_5(%arg0: i32) -> (i32, i32) {
    %c0_i32 = arith.constant 0 : i32
    %c0_i32_0 = arith.constant 0 : i32
    return %arg0, %c0_i32 : i32, i32
  }
}

module attributes {stable_mosaic.version = 11 : i64} {
  func.func @ffn_kernel(%arg0: i32, %arg1: memref<16x128xbf16, #tpu.memory_space<vmem>>, %arg2: memref<128x128xbf16, #tpu.memory_space<vmem>>, %arg3: memref<1x128xf32, #tpu.memory_space<vmem>>, %arg4: memref<128x128xbf16, #tpu.memory_space<vmem>>, %arg5: memref<1x128xf32, #tpu.memory_space<vmem>>, %arg6: memref<16x128xf32, #tpu.memory_space<vmem>>) attributes {dimension_semantics = [#tpu.dimension_semantics<parallel>], iteration_bounds = array<i64: 1>, scalar_prefetch = 0 : i64, scratch_operands = 0 : i64, tpu.core_type = #tpu.core_type<tc>, window_params = [{transform_indices = @transform_0, window_bounds = array<i64: 16, 128>}, {pipeline_mode = #tpu.pipeline_mode<synchronous>, transform_indices = @transform_1, window_bounds = array<i64: 128, 128>}, {pipeline_mode = #tpu.pipeline_mode<synchronous>, transform_indices = @transform_2, window_bounds = array<i64: 1, 128>}, {pipeline_mode = #tpu.pipeline_mode<synchronous>, transform_indices = @transform_3, window_bounds = array<i64: 128, 128>}, {pipeline_mode = #tpu.pipeline_mode<synchronous>, transform_indices = @transform_4, window_bounds = array<i64: 1, 128>}, {transform_indices = @transform_5, window_bounds = array<i64: 16, 128>}]} {
    %c0 = arith.constant 0 : index
    %c0_0 = arith.constant 0 : index
    %0 = vector.load %arg1[%c0, %c0_0] : memref<16x128xbf16, #tpu.memory_space<vmem>>, vector<16x128xbf16>
    %c0_1 = arith.constant 0 : index
    %c0_2 = arith.constant 0 : index
    %1 = vector.load %arg2[%c0_1, %c0_2] : memref<128x128xbf16, #tpu.memory_space<vmem>>, vector<128x128xbf16>
    %cst = arith.constant dense<0.000000e+00> : vector<16x128xf32>
    %2 = tpu.matmul %0, %1, %cst {dimension_numbers = #tpu.dot_dimension_numbers<[1], [0], [0], [1], [0, 0, 1, 1], [], []>} : vector<16x128xbf16>, vector<128x128xbf16>, vector<16x128xf32> -> vector<16x128xf32>
    %c0_3 = arith.constant 0 : index
    %c0_4 = arith.constant 0 : index
    %3 = vector.load %arg3[%c0_3, %c0_4] : memref<1x128xf32, #tpu.memory_space<vmem>>, vector<1x128xf32>
    %4 = vector.broadcast %3 : vector<1x128xf32> to vector<16x128xf32>
    %5 = arith.addf %2, %4 : vector<16x128xf32>
    %cst_5 = arith.constant 0.000000e+00 : f32
    %6 = vector.broadcast %cst_5 : f32 to vector<16x128xf32>
    %7 = arith.maximumf %5, %6 : vector<16x128xf32>
    %8 = arith.truncf %7 : vector<16x128xf32> to vector<16x128xbf16>
    %c0_6 = arith.constant 0 : index
    %c0_7 = arith.constant 0 : index
    %9 = vector.load %arg4[%c0_6, %c0_7] : memref<128x128xbf16, #tpu.memory_space<vmem>>, vector<128x128xbf16>
    %cst_8 = arith.constant dense<0.000000e+00> : vector<16x128xf32>
    %10 = tpu.matmul %8, %9, %cst_8 {dimension_numbers = #tpu.dot_dimension_numbers<[1], [0], [0], [1], [0, 0, 1, 1], [], []>} : vector<16x128xbf16>, vector<128x128xbf16>, vector<16x128xf32> -> vector<16x128xf32>
    %c0_9 = arith.constant 0 : index
    %c0_10 = arith.constant 0 : index
    %11 = vector.load %arg5[%c0_9, %c0_10] : memref<1x128xf32, #tpu.memory_space<vmem>>, vector<1x128xf32>
    %12 = vector.broadcast %11 : vector<1x128xf32> to vector<16x128xf32>
    %13 = arith.addf %10, %12 : vector<16x128xf32>
    %c0_11 = arith.constant 0 : index
    %c0_12 = arith.constant 0 : index
    %14 = vector.load %arg6[%c0_11, %c0_12] : memref<16x128xf32, #tpu.memory_space<vmem>>, vector<16x128xf32>
    tpu.vector_store %arg6[%c0_11, %c0_12], %13 {strides = array<i32>} : memref<16x128xf32, #tpu.memory_space<vmem>>, vector<16x128xf32>,
    return
  }
  func.func @transform_0(%arg0: i32) -> (i32, i32) {
    %c0_i32 = arith.constant 0 : i32
    %c0_i32_0 = arith.constant 0 : i32
    return %arg0, %c0_i32 : i32, i32
  }
  func.func @transform_1(%arg0: i32) -> (i32, i32) {
    %c0_i32 = arith.constant 0 : i32
    %c0_i32_0 = arith.constant 0 : i32
    %c0_i32_1 = arith.constant 0 : i32
    return %c0_i32, %c0_i32_0 : i32, i32
  }
  func.func @transform_2(%arg0: i32) -> (i32, i32) {
    %c0_i32 = arith.constant 0 : i32
    %c0_i32_0 = arith.constant 0 : i32
    %c0_i32_1 = arith.constant 0 : i32
    return %c0_i32, %c0_i32_0 : i32, i32
  }
  func.func @transform_3(%arg0: i32) -> (i32, i32) {
    %c0_i32 = arith.constant 0 : i32
    %c0_i32_0 = arith.constant 0 : i32
    %c0_i32_1 = arith.constant 0 : i32
    return %c0_i32, %c0_i32_0 : i32, i32
  }
  func.func @transform_4(%arg0: i32) -> (i32, i32) {
    %c0_i32 = arith.constant 0 : i32
    %c0_i32_0 = arith.constant 0 : i32
    %c0_i32_1 = arith.constant 0 : i32
    return %c0_i32, %c0_i32_0 : i32, i32
  }
  func.func @transform_5(%arg0: i32) -> (i32, i32) {
    %c0_i32 = arith.constant 0 : i32
    %c0_i32_0 = arith.constant 0 : i32
    return %arg0, %c0_i32 : i32, i32
  }
}

</mosaic_0001>

<bundles_post_ra>
// kernel: tpu_custom_call.1
= control target key start
LH: loop header
LB: loop body
LE: loop exit
PB: predicated region body
PF: predicated region fallthrough
CT: control target
= control target key end

     0   :  { %10 = vsyncpa [#allocation3], 0  ;;  %s518_s0 = inlined_call_operand.hbm [shape: bf16[16,128], index: 0, kind: input, shape index: {}]   ;;  %s519_s1 = inlined_call_operand.hbm [shape: bf16[128,128], index: 1, kind: input, shape index: {}]   ;;  %s520_s2 = inlined_call_operand.vmem [shape: f32[1,128], index: 2, kind: input, shape index: {}]   ;;  %s521_s3 = inlined_call_operand.hbm [shape: bf16[128,128], index: 3, kind: input, shape index: {}]   ;;  %s522_s4 = inlined_call_operand.vmem [shape: f32[1,128], index: 4, kind: input, shape index: {}]   ;;  %s523_s5 = inlined_call_operand.hbm [shape: f32[16,128], index: 5, kind: output, shape index: {}]  }
   0x1   :  { %11 = vsyncpa [#allocation6], 0 }
   0x2   :  { %12 = vsyncpa [#allocation4], 0  ;;  %s30_s20 = sshll.u32 %s519_s1, 4  ;;  %s462_s21 = smov [#allocation5]   ;;  %s31_s20 = int_to_ptr.hbm [resolvable:$true] %s30_s20 }
   0x3   :  { %s32_s22 = sshll.u32 %s462_s21, 4  ;;  %s17_s25 = sshll.u32 %s518_s0, 4  ;;  %s33_s22 = int_to_ptr.vmem [resolvable:$true] %s32_s22  ;;  %s18_s25 = int_to_ptr.hbm [resolvable:$true] %s17_s25 }
   0x4   :  { %s463_s26 = smov 64   ;;  %s464_s27 = smov 4  }
   0x5   :  { %38 = dma.hbm_to_vmem [thread:$0]  %s31_s20, 1024, %s33_s22, [#allocation6], %s463_s26, %s463_s26, %s464_s27  }
   0x6   :  { %s465_s28 = smov [#allocation2]   ;;  %s45_s7 = sshll.u32 %s521_s3, 4  ;;  %s46_s7 = int_to_ptr.hbm [resolvable:$true] %s45_s7 }
   0x7   :  { %s19_s29 = sshll.u32 %s465_s28, 4  ;;  %s466_s1 = smov [#allocation7]   ;;  %s20_s29 = int_to_ptr.vmem [resolvable:$true] %s19_s29 }
   0x8   :  { %25 = dma.hbm_to_vmem [thread:$0]  %s18_s25, 128, %s20_s29, [#allocation3], %s463_s26, %s463_s26, %s464_s27  }
   0x9   :  { %s47_s8 = sshll.u32 %s466_s1, 4  ;;  %s48_s8 = int_to_ptr.vmem [resolvable:$true] %s47_s8 }
   0xa   :  { %53 = dma.hbm_to_vmem [thread:$0]  %s46_s7, 1024, %s48_s8, [#allocation6], %s463_s26, %s463_s26, %s464_s27  }
   0xb   :  { %456 = dma.done.wait [#allocation3], 128  }
   0xc   :  { %457 = vsyncadd [#allocation3], 4294967168 }
   0xd   :  { %458 = dma.done.wait [#allocation6], 2048  }
   0xe   :  { %459 = vsyncadd [#allocation6], 4294965248  ;;  %v341_v0 = vld [vmem:[#allocation5 + $0x38] sm:$0xff]  ;;  %v340_v1 = vld [vmem:[#allocation5 + $0x30] sm:$0xff]  ;;  %s467_s11 = smov [#allocation8]   ;;  %s468_s15 = smov 128  }
   0xf   :  { %144 = vmatpush.bf16.msra.mxu0 %v341_v0  ;;  %v349_v2 = vld [vmem:[#allocation7 + $0x38] sm:$0xff]  ;;  %v348_v3 = vld [vmem:[#allocation7 + $0x30] sm:$0xff]  ;;  %v339_v4 = vld [vmem:[#allocation5 + $0x28] sm:$0xff]  ;;  %s249_s12 = sshll.u32 %s467_s11, 4  ;;  %s469_s16 = smov 8   ;;  %s250_s12 = int_to_ptr.vmem [resolvable:$true] %s249_s12 }
  0x10   :  { %229 = vmatpush.bf16.msra.mxu1 %v349_v2  ;;  %v347_v5 = vld [vmem:[#allocation7 + $0x28] sm:$0xff]  ;;  %v338_v6 = vld [vmem:[#allocation5 + $0x20] sm:$0xff]  ;;  %v337_v8 = vld [vmem:[#allocation5 + $0x18] sm:$0xff] }
  0x11   :  { %v346_v7 = vld [vmem:[#allocation7 + $0x20] sm:$0xff]  ;;  %v336_v9 = vld [vmem:[#allocation5 + $0x10] sm:$0xff]  ;;  %v335_v10 = vld [vmem:[#allocation5 + $0x8] sm:$0xff] }
  0x12   :  { %v334_v11 = vld [vmem:[#allocation5] sm:$0xff]  ;;  %v333_v12 = vld [vmem:[#allocation2] sm:$0xff]  ;;  %v344_v14 = vld [vmem:[#allocation7 + $0x10] sm:$0xff] }
  0x13   :  { %145 = vmatpush.bf16.msra.mxu0 %v340_v1  ;;  %v345_v13 = vld [vmem:[#allocation7 + $0x18] sm:$0xff]  ;;  %v343_v15 = vld [vmem:[#allocation7 + $0x8] sm:$0xff]  ;;  %v342_v16 = vld [vmem:[#allocation7] sm:$0xff] }
  0x14   :  { %230 = vmatpush.bf16.msra.mxu1 %v348_v3  ;;  %v358_v18 = vld [vmem:[%s520_s2] ss:$0 sm:$0xff]  ;;  %s251_s2 = sshll.u32 %s523_s5, 4  ;;  %s252_s2 = int_to_ptr.hbm [resolvable:$true] %s251_s2 }
  0x15   :  { %v359_v25 = vld [vmem:[%s522_s4] ss:$0 sm:$0xff] }
  0x17   :  { %146 = vmatpush.bf16.msra.mxu0 %v339_v4 }
  0x18   :  { %231 = vmatpush.bf16.msra.mxu1 %v347_v5 }
  0x1b   :  { %147 = vmatpush.bf16.msra.mxu0 %v338_v6 }
  0x1c   :  { %232 = vmatpush.bf16.msra.mxu1 %v346_v7 }
  0x1f   :  { %148 = vmatpush.bf16.msra.mxu0 %v337_v8 }
  0x20   :  { %233 = vmatpush.bf16.msra.mxu1 %v345_v13 }
  0x23   :  { %149 = vmatpush.bf16.msra.mxu0 %v336_v9 }
  0x24   :  { %234 = vmatpush.bf16.msra.mxu1 %v344_v14 }
  0x27   :  { %150 = vmatpush.bf16.msra.mxu0 %v335_v10 }
  0x28   :  { %235 = vmatpush.bf16.msra.mxu1 %v343_v15 }
  0x2b   :  { %151 = vmatpush.bf16.msra.mxu0 %v334_v11 }
  0x2c   :  { %236 = vmatpush.bf16.msra.mxu1 %v342_v16 }
  0x2e   :  { %152 = vmatmul.bf16.vlgmr.msra.gmra.mxu0 %v333_v12 }
  0xab   :  { %v153_v17 = vpop.f32.mrf.mxu0 }
  0xac   :  { %v154_v19 = vadd.f32 %v358_v18, %v153_v17 }
  0xae   :  { %v158_v22 = vmax.f32 %v154_v19, 0.0 }
  0xb3   :  { %v155_v20 = vpop.f32.mrf.mxu0 }
  0xb4   :  { %v156_v21 = vadd.f32 %v358_v18, %v155_v20 }
  0xb6   :  { %v159_v23 = vmax.f32 %v156_v21, 0.0 }
  0xb8   :  { %v160_v24 = vpack.c.bf16 %v159_v23, %v158_v22 }
  0xba   :  { %237 = vmatmul.bf16.vlgmr.msra.gmra.mxu1 %v160_v24 }
 0x137   :  { %v238_v26 = vpop.f32.mrf.mxu1 }
 0x138   :  { %v239_v27 = vadd.f32 %v359_v25, %v238_v26 }
 0x13a   :  { %243 = vst [vmem:[#allocation8] sm:$0xff] %v239_v27 }
 0x13f   :  { %v240_v28 = vpop.f32.mrf.mxu1 }
 0x140   :  { %v241_v29 = vadd.f32 %v359_v25, %v240_v28 }
 0x142   :  { %244 = vst [vmem:[#allocation8 + $0x8] sm:$0xff] %v241_v29 }
 0x143   :  { %257 = dma.vmem_to_hbm [thread:$0]  %s250_s12, 256, %s252_s2, [#allocation4], %s468_s15, %s468_s15, %s469_s16  }
 0x144   :  { %460 = dma.done.wait [#allocation4], 256  }
 0x145   :  { %461 = vsyncadd [#allocation4], 4294967040 }
 0x146   :  { %262 = vsyncpa [#allocation3], 1 }
 0x147   :  { %263 = vsyncpa [#allocation6], 1 }
 0x148   :  { %264 = vsyncpa [#allocation4], 1 }

// kernel: tpu_custom_call.1
= control target key start
LH: loop header
LB: loop body
LE: loop exit
PB: predicated region body
PF: predicated region fallthrough
CT: control target
= control target key end

     0   :  { %10 = vsyncpa [#allocation3], 0  ;;  %s518_s0 = inlined_call_operand.hbm [shape: bf16[16,128], index: 0, kind: input, shape index: {}]   ;;  %s519_s1 = inlined_call_operand.hbm [shape: bf16[128,128], index: 1, kind: input, shape index: {}]   ;;  %s520_s2 = inlined_call_operand.vmem [shape: f32[1,128], index: 2, kind: input, shape index: {}]   ;;  %s521_s3 = inlined_call_operand.hbm [shape: bf16[128,128], index: 3, kind: input, shape index: {}]   ;;  %s522_s4 = inlined_call_operand.vmem [shape: f32[1,128], index: 4, kind: input, shape index: {}]   ;;  %s523_s5 = inlined_call_operand.hbm [shape: f32[16,128], index: 5, kind: output, shape index: {}]  }
   0x1   :  { %11 = vsyncpa [#allocation6], 0 }
   0x2   :  { %12 = vsyncpa [#allocation4], 0  ;;  %s30_s20 = sshll.u32 %s519_s1, 4  ;;  %s462_s21 = smov [#allocation5]   ;;  %s31_s20 = int_to_ptr.hbm [resolvable:$true] %s30_s20 }
   0x3   :  { %s32_s22 = sshll.u32 %s462_s21, 4  ;;  %s17_s25 = sshll.u32 %s518_s0, 4  ;;  %s33_s22 = int_to_ptr.vmem [resolvable:$true] %s32_s22  ;;  %s18_s25 = int_to_ptr.hbm [resolvable:$true] %s17_s25 }
   0x4   :  { %s463_s26 = smov 64   ;;  %s464_s27 = smov 4  }
   0x5   :  { %38 = dma.hbm_to_vmem [thread:$0]  %s31_s20, 1024, %s33_s22, [#allocation6], %s463_s26, %s463_s26, %s464_s27  }
   0x6   :  { %s465_s28 = smov [#allocation2]   ;;  %s45_s7 = sshll.u32 %s521_s3, 4  ;;  %s46_s7 = int_to_ptr.hbm [resolvable:$true] %s45_s7 }
   0x7   :  { %s19_s29 = sshll.u32 %s465_s28, 4  ;;  %s466_s1 = smov [#allocation7]   ;;  %s20_s29 = int_to_ptr.vmem [resolvable:$true] %s19_s29 }
   0x8   :  { %25 = dma.hbm_to_vmem [thread:$0]  %s18_s25, 128, %s20_s29, [#allocation3], %s463_s26, %s463_s26, %s464_s27  }
   0x9   :  { %s47_s8 = sshll.u32 %s466_s1, 4  ;;  %s48_s8 = int_to_ptr.vmem [resolvable:$true] %s47_s8 }
   0xa   :  { %53 = dma.hbm_to_vmem [thread:$0]  %s46_s7, 1024, %s48_s8, [#allocation6], %s463_s26, %s463_s26, %s464_s27  }
   0xb   :  { %456 = dma.done.wait [#allocation3], 128  }
   0xc   :  { %457 = vsyncadd [#allocation3], 4294967168 }
   0xd   :  { %458 = dma.done.wait [#allocation6], 2048  }
   0xe   :  { %459 = vsyncadd [#allocation6], 4294965248  ;;  %v341_v0 = vld [vmem:[#allocation5 + $0x38] sm:$0xff]  ;;  %v340_v1 = vld [vmem:[#allocation5 + $0x30] sm:$0xff]  ;;  %s467_s11 = smov [#allocation8]   ;;  %s468_s15 = smov 128  }
   0xf   :  { %144 = vmatpush.bf16.msra.mxu0 %v341_v0  ;;  %v349_v2 = vld [vmem:[#allocation7 + $0x38] sm:$0xff]  ;;  %v348_v3 = vld [vmem:[#allocation7 + $0x30] sm:$0xff]  ;;  %v339_v4 = vld [vmem:[#allocation5 + $0x28] sm:$0xff]  ;;  %s249_s12 = sshll.u32 %s467_s11, 4  ;;  %s469_s16 = smov 8   ;;  %s250_s12 = int_to_ptr.vmem [resolvable:$true] %s249_s12 }
  0x10   :  { %229 = vmatpush.bf16.msra.mxu1 %v349_v2  ;;  %v347_v5 = vld [vmem:[#allocation7 + $0x28] sm:$0xff]  ;;  %v338_v6 = vld [vmem:[#allocation5 + $0x20] sm:$0xff]  ;;  %v337_v8 = vld [vmem:[#allocation5 + $0x18] sm:$0xff] }
  0x11   :  { %v346_v7 = vld [vmem:[#allocation7 + $0x20] sm:$0xff]  ;;  %v336_v9 = vld [vmem:[#allocation5 + $0x10] sm:$0xff]  ;;  %v335_v10 = vld [vmem:[#allocation5 + $0x8] sm:$0xff] }
  0x12   :  { %v334_v11 = vld [vmem:[#allocation5] sm:$0xff]  ;;  %v333_v12 = vld [vmem:[#allocation2] sm:$0xff]  ;;  %v344_v14 = vld [vmem:[#allocation7 + $0x10] sm:$0xff] }
  0x13   :  { %145 = vmatpush.bf16.msra.mxu0 %v340_v1  ;;  %v345_v13 = vld [vmem:[#allocation7 + $0x18] sm:$0xff]  ;;  %v343_v15 = vld [vmem:[#allocation7 + $0x8] sm:$0xff]  ;;  %v342_v16 = vld [vmem:[#allocation7] sm:$0xff] }
  0x14   :  { %230 = vmatpush.bf16.msra.mxu1 %v348_v3  ;;  %v358_v18 = vld [vmem:[%s520_s2] ss:$0 sm:$0xff]  ;;  %s251_s2 = sshll.u32 %s523_s5, 4  ;;  %s252_s2 = int_to_ptr.hbm [resolvable:$true] %s251_s2 }
  0x15   :  { %v359_v25 = vld [vmem:[%s522_s4] ss:$0 sm:$0xff] }
  0x17   :  { %146 = vmatpush.bf16.msra.mxu0 %v339_v4 }
  0x18   :  { %231 = vmatpush.bf16.msra.mxu1 %v347_v5 }
  0x1b   :  { %147 = vmatpush.bf16.msra.mxu0 %v338_v6 }
  0x1c   :  { %232 = vmatpush.bf16.msra.mxu1 %v346_v7 }
  0x1f   :  { %148 = vmatpush.bf16.msra.mxu0 %v337_v8 }
  0x20   :  { %233 = vmatpush.bf16.msra.mxu1 %v345_v13 }
  0x23   :  { %149 = vmatpush.bf16.msra.mxu0 %v336_v9 }
  0x24   :  { %234 = vmatpush.bf16.msra.mxu1 %v344_v14 }
  0x27   :  { %150 = vmatpush.bf16.msra.mxu0 %v335_v10 }
  0x28   :  { %235 = vmatpush.bf16.msra.mxu1 %v343_v15 }
  0x2b   :  { %151 = vmatpush.bf16.msra.mxu0 %v334_v11 }
  0x2c   :  { %236 = vmatpush.bf16.msra.mxu1 %v342_v16 }
  0x2e   :  { %152 = vmatmul.bf16.vlgmr.msra.gmra.mxu0 %v333_v12 }
  0xab   :  { %v153_v17 = vpop.f32.mrf.mxu0 }
  0xac   :  { %v154_v19 = vadd.f32 %v358_v18, %v153_v17 }
  0xae   :  { %v158_v22 = vmax.f32 %v154_v19, 0.0 }
  0xb3   :  { %v155_v20 = vpop.f32.mrf.mxu0 }
  0xb4   :  { %v156_v21 = vadd.f32 %v358_v18, %v155_v20 }
  0xb6   :  { %v159_v23 = vmax.f32 %v156_v21, 0.0 }
  0xb8   :  { %v160_v24 = vpack.c.bf16 %v159_v23, %v158_v22 }
  0xba   :  { %237 = vmatmul.bf16.vlgmr.msra.gmra.mxu1 %v160_v24 }
 0x137   :  { %v238_v26 = vpop.f32.mrf.mxu1 }
 0x138   :  { %v239_v27 = vadd.f32 %v359_v25, %v238_v26 }
 0x13a   :  { %243 = vst [vmem:[#allocation8] sm:$0xff] %v239_v27 }
 0x13f   :  { %v240_v28 = vpop.f32.mrf.mxu1 }
 0x140   :  { %v241_v29 = vadd.f32 %v359_v25, %v240_v28 }
 0x142   :  { %244 = vst [vmem:[#allocation8 + $0x8] sm:$0xff] %v241_v29 }
 0x143   :  { %257 = dma.vmem_to_hbm [thread:$0]  %s250_s12, 256, %s252_s2, [#allocation4], %s468_s15, %s468_s15, %s469_s16  }
 0x144   :  { %460 = dma.done.wait [#allocation4], 256  }
 0x145   :  { %461 = vsyncadd [#allocation4], 4294967040 }
 0x146   :  { %262 = vsyncpa [#allocation3], 1 }
 0x147   :  { %263 = vsyncpa [#allocation6], 1 }
 0x148   :  { %264 = vsyncpa [#allocation4], 1 }

</bundles_post_ra>
